<compile_context>
chip_gen: v5e
topology: v5e:2x2
jax: 0.10.0
libtpu: 0.0.40
codegen_flags: <defaults>
</compile_context>

<pallas_src>
import functools

import jax
import jax.numpy as jnp
from jax.experimental import pallas as pl
from jax.experimental.pallas import tpu as pltpu


def _round_up(x: int, m: int) -> int:
    return (x + m - 1) // m * m


def classifier_kernel(batch_ref, x_ref, w1_ref, b1_ref, w2_ref, b2_ref,
                      out_ref, summed_acc, counts_acc):
    # batch_ref:  (1, TILE_N) int32    graph id per node (B_pad for padding rows)
    # x_ref:      (TILE_N, H) bfloat16 node features tile
    # w1_ref:     (H, H2) f32, b1_ref: (1, H2) f32
    # w2_ref:     (H2, C_pad) f32, b2_ref: (1, C_pad) f32   (zero-padded to 128 lanes)
    # out_ref:    (B_pad, C_pad) f32
    # summed_acc: (B_pad, H) f32 scratch, counts_acc: (B_pad, 1) f32 scratch
    k = pl.program_id(0)

    @pl.when(k == 0)
    def _init():
        summed_acc[...] = jnp.zeros_like(summed_acc)
        counts_acc[...] = jnp.zeros_like(counts_acc)

    batch = batch_ref[...]                               # (1, TILE_N)
    b_pad = summed_acc.shape[0]
    tile_n = batch.shape[1]

    # One-hot segment mask (B_pad, TILE_N); padded nodes carry id == B_pad and
    # therefore never match any row of the iota.
    graph_ids = jax.lax.broadcasted_iota(jnp.int32, (b_pad, tile_n), 0)
    mask_f32 = (graph_ids == batch).astype(jnp.float32)

    # Per-graph node counts (exact f32 reduce on the XLU).
    counts_acc[...] += jnp.sum(mask_f32, axis=1, keepdims=True)

    # Segment sum via bf16 one-hot matmul on the MXU, f32 accumulation.
    summed_acc[...] += jnp.dot(
        mask_f32.astype(jnp.bfloat16), x_ref[...],
        preferred_element_type=jnp.float32)

    @pl.when(k == pl.num_programs(0) - 1)
    def _epilogue():
        # --- global_mean_pool finalize ---
        inv = pl.reciprocal(jnp.maximum(counts_acc[...], 1.0), approx=True)
        pooled = summed_acc[...] * inv                   # (B_pad, H)

        # --- final_MLP: Linear -> ReLU -> Linear ---
        h = jnp.dot(pooled, w1_ref[...],
                    preferred_element_type=jnp.float32) + b1_ref[...]
        h = jnp.maximum(h, 0.0)
        logits = jnp.dot(h, w2_ref[...],
                         preferred_element_type=jnp.float32) + b2_ref[...]
        out_ref[...] = logits                            # (B_pad, C_pad), lane-dense store


@functools.partial(jax.jit, static_argnames=("num_graphs", "tile_n_max"))
def classifier_forward(x_e, batch_node, w1, b1, w2, b2, num_graphs,
                       tile_n_max=512):
    N, H = x_e.shape
    H2 = w1.shape[1]
    C = w2.shape[1]
    B = num_graphs

    # Sublane-align the graph axis, lane-align the class axis.
    B_pad = max(8, _round_up(B, 8))
    C_pad = max(128, _round_up(C, 128))

    # Node-axis tiling: single 8-aligned tile for small N, otherwise 512-row
    # tiles (multiple of 256 for the v6e/v7x MXU, 128 for v5e).
    if N <= tile_n_max:
        tile_n = max(8, _round_up(N, 8))
    else:
        tile_n = tile_n_max
    n_pad = _round_up(N, tile_n)
    grid = (n_pad // tile_n,)

    # Pad node arrays along N. Padded rows get batch id == B_pad so they are
    # dropped by the one-hot mask (never added to any graph's sum / count).
    x_p = jnp.zeros((n_pad, H), jnp.bfloat16).at[:N].set(x_e.astype(jnp.bfloat16))
    batch_p = (jnp.full((1, n_pad), B_pad, jnp.int32)
               .at[0, :N].set(batch_node.astype(jnp.int32)))

    w1_f = w1.astype(jnp.float32)
    b1_2d = b1.reshape(1, H2).astype(jnp.float32)
    w2_p = jnp.zeros((H2, C_pad), jnp.float32).at[:, :C].set(w2.astype(jnp.float32))
    b2_p = jnp.zeros((1, C_pad), jnp.float32).at[0, :C].set(b2.astype(jnp.float32))

    # VMEM budget: double-buffered node tiles + resident weights + scratch/out.
    est = (2 * (tile_n * H * 2 + tile_n * 4)
           + 2 * ((H * H2 + H2 * C_pad) * 4 + (H2 + C_pad) * 4)
           + B_pad * H * 4 + B_pad * 128 * 4
           + 2 * B_pad * C_pad * 4)
    vmem_limit = int(min(max(4 * est + (2 << 20), 16 << 20), 64 << 20))

    cost = pl.CostEstimate(
        flops=int(2 * B_pad * n_pad * H + 2 * B_pad * H * H2 + 2 * B_pad * H2 * C_pad),
        transcendentals=int(B_pad),
        bytes_accessed=int(n_pad * H * 2 + n_pad * 4
                           + (H * H2 + H2 * C_pad + H2 + C_pad) * 4
                           + B_pad * C_pad * 4),
    )

    grid_spec = pltpu.PrefetchScalarGridSpec(
        num_scalar_prefetch=0,
        grid=grid,
        in_specs=[
            pl.BlockSpec((1, tile_n), lambda k: (0, k)),      # batch ids
            pl.BlockSpec((tile_n, H), lambda k: (k, 0)),      # node features
            pl.BlockSpec((H, H2), lambda k: (0, 0)),          # w1 (resident)
            pl.BlockSpec((1, H2), lambda k: (0, 0)),          # b1
            pl.BlockSpec((H2, C_pad), lambda k: (0, 0)),      # w2 (lane-padded)
            pl.BlockSpec((1, C_pad), lambda k: (0, 0)),       # b2
        ],
        out_specs=pl.BlockSpec((B_pad, C_pad), lambda k: (0, 0)),
        scratch_shapes=[
            pltpu.VMEM((B_pad, H), jnp.float32),              # segment sums
            pltpu.VMEM((B_pad, 1), jnp.float32),              # segment counts
        ],
    )

    out_padded = pl.pallas_call(
        classifier_kernel,
        out_shape=jax.ShapeDtypeStruct((B_pad, C_pad), jnp.float32),
        grid_spec=grid_spec,
        compiler_params=pltpu.CompilerParams(
            dimension_semantics=("arbitrary",),               # N axis is a reduction
            vmem_limit_bytes=vmem_limit,
        ),
        cost_estimate=cost,
    )(batch_p, x_p, w1_f, b1_2d, w2_p, b2_p)

    return out_padded[:B, :C]


def reference_forward(x_e, batch_node, w1, b1, w2, b2, num_graphs):
    # Pure-JAX (f32) reference of the same forward pass.
    mask = (jnp.arange(num_graphs)[:, None] == batch_node[None, :]).astype(jnp.float32)
    summed = mask @ x_e
    counts = jnp.maximum(mask.sum(axis=1, keepdims=True), 1.0)
    pooled = summed / counts
    h = jnp.maximum(pooled @ w1 + b1[None, :], 0.0)
    return h @ w2 + b2[None, :]


if __name__ == "__main__":
    key = jax.random.PRNGKey(0)

    # Small shapes consistent with the module:
    #   hidden_dim = 32, num_classes = 4, 2 graphs, 16 nodes total.
    N = 16          # total nodes across the batch
    H = 32          # config.model.hidden_dim
    H2 = H // 2     # hidden_dim // 2
    C = 4           # config.num_classes
    B = 2           # number of graphs in the batch

    k_x, k_w1, k_b1, k_w2, k_b2 = jax.random.split(key, 5)
    x_e = jax.random.normal(k_x, (N, H), dtype=jnp.float32)
    # First 8 nodes belong to graph 0, next 8 to graph 1.
    batch_node = jnp.concatenate(
        [jnp.zeros((N // 2,), jnp.int32), jnp.ones((N - N // 2,), jnp.int32)]
    )

    # Deterministic parameter init (final_MLP: H -> H//2 -> C).
    w1 = jax.random.normal(k_w1, (H, H2), dtype=jnp.float32) * (1.0 / jnp.sqrt(H))
    b1 = jax.random.normal(k_b1, (H2,), dtype=jnp.float32) * 0.01
    w2 = jax.random.normal(k_w2, (H2, C), dtype=jnp.float32) * (1.0 / jnp.sqrt(H2))
    b2 = jax.random.normal(k_b2, (C,), dtype=jnp.float32) * 0.01

    logits = classifier_forward(x_e, batch_node, w1, b1, w2, b2, B)
    logits = jax.block_until_ready(logits)

    ref = reference_forward(x_e, batch_node, w1, b1, w2, b2, B)
    assert logits.shape == (B, C)
    # bf16 node features + approximate reciprocal in the pool -> loose tolerance
    # vs the pure-f32 reference.
    assert jnp.allclose(logits, ref, atol=5e-2, rtol=5e-2), "mismatch vs reference"

    print("KERNEL_OK")
</pallas_src>

<mosaic_0001>
module attributes {stable_mosaic.version = 11 : i64} {
  func.func @classifier_kernel(%arg0: i32, %arg1: memref<1x16xi32, #tpu.memory_space<vmem>>, %arg2: memref<16x32xbf16, #tpu.memory_space<vmem>>, %arg3: memref<32x16xf32, #tpu.memory_space<vmem>>, %arg4: memref<1x16xf32, #tpu.memory_space<vmem>>, %arg5: memref<16x128xf32, #tpu.memory_space<vmem>>, %arg6: memref<1x128xf32, #tpu.memory_space<vmem>>, %arg7: memref<8x128xf32, #tpu.memory_space<vmem>>, %arg8: memref<8x32xf32, #tpu.memory_space<vmem>>, %arg9: memref<8x1xf32, #tpu.memory_space<vmem>>) attributes {dimension_semantics = [#tpu.dimension_semantics<arbitrary>], iteration_bounds = array<i64: 1>, scalar_prefetch = 0 : i64, scratch_operands = 2 : i64, tpu.core_type = #tpu.core_type<tc>, window_params = [{transform_indices = @transform_0, window_bounds = array<i64: 1, 16>}, {transform_indices = @transform_1, window_bounds = array<i64: 16, 32>}, {pipeline_mode = #tpu.pipeline_mode<synchronous>, transform_indices = @transform_2, window_bounds = array<i64: 32, 16>}, {pipeline_mode = #tpu.pipeline_mode<synchronous>, transform_indices = @transform_3, window_bounds = array<i64: 1, 16>}, {pipeline_mode = #tpu.pipeline_mode<synchronous>, transform_indices = @transform_4, window_bounds = array<i64: 16, 128>}, {pipeline_mode = #tpu.pipeline_mode<synchronous>, transform_indices = @transform_5, window_bounds = array<i64: 1, 128>}, {pipeline_mode = #tpu.pipeline_mode<synchronous>, transform_indices = @transform_6, window_bounds = array<i64: 8, 128>}]} {
    %c0_i32 = arith.constant 0 : i32
    %0 = arith.cmpi eq, %arg0, %c0_i32 : i32
    %1 = arith.extui %0 : i1 to i32
    %c0_i32_0 = arith.constant 0 : i32
    %2 = arith.cmpi ne, %1, %c0_i32_0 : i32
    scf.if %2 {
      %cst_15 = arith.constant 0.000000e+00 : f32
      %23 = vector.broadcast %cst_15 : f32 to vector<8x32xf32>
      %c0_16 = arith.constant 0 : index
      %c0_17 = arith.constant 0 : index
      %24 = vector.load %arg8[%c0_16, %c0_17] : memref<8x32xf32, #tpu.memory_space<vmem>>, vector<8x32xf32>
      tpu.vector_store %arg8[%c0_16, %c0_17], %23 {strides = array<i32>} : memref<8x32xf32, #tpu.memory_space<vmem>>, vector<8x32xf32>,
      %cst_18 = arith.constant 0.000000e+00 : f32
      %25 = vector.broadcast %cst_18 : f32 to vector<8x1xf32>
      %c0_19 = arith.constant 0 : index
      %c0_20 = arith.constant 0 : index
      %26 = vector.load %arg9[%c0_19, %c0_20] : memref<8x1xf32, #tpu.memory_space<vmem>>, vector<8x1xf32>
      tpu.vector_store %arg9[%c0_19, %c0_20], %25 {strides = array<i32>} : memref<8x1xf32, #tpu.memory_space<vmem>>, vector<8x1xf32>,
    } else {
    }
    %c0 = arith.constant 0 : index
    %c0_1 = arith.constant 0 : index
    %3 = vector.load %arg1[%c0, %c0_1] : memref<1x16xi32, #tpu.memory_space<vmem>>, vector<1x16xi32>
    %4 = tpu.iota {dimensions = array<i32: 0>} : vector<8x16xi32>
    %5 = vector.broadcast %3 : vector<1x16xi32> to vector<8x16xi32>
    %6 = arith.cmpi eq, %4, %5 : vector<8x16xi32>
    %7 = arith.extui %6 : vector<8x16xi1> to vector<8x16xi32>
    %8 = arith.sitofp %7 : vector<8x16xi32> to vector<8x16xf32>
    %c0_2 = arith.constant 0 : index
    %c0_3 = arith.constant 0 : index
    %9 = vector.load %arg9[%c0_2, %c0_3] : memref<8x1xf32, #tpu.memory_space<vmem>>, vector<8x1xf32>
    %cst = arith.constant dense<0.000000e+00> : vector<8xf32>
    %10 = vector.multi_reduction <add>, %8, %cst [1] : vector<8x16xf32> to vector<8xf32>
    %11 = vector.shape_cast %10 : vector<8xf32> to vector<8x1xf32>
    %12 = arith.addf %9, %11 : vector<8x1xf32>
    %c0_4 = arith.constant 0 : index
    %c0_5 = arith.constant 0 : index
    %13 = vector.load %arg9[%c0_4, %c0_5] : memref<8x1xf32, #tpu.memory_space<vmem>>, vector<8x1xf32>
    tpu.vector_store %arg9[%c0_4, %c0_5], %12 {strides = array<i32>} : memref<8x1xf32, #tpu.memory_space<vmem>>, vector<8x1xf32>,
    %c0_6 = arith.constant 0 : index
    %c0_7 = arith.constant 0 : index
    %14 = vector.load %arg8[%c0_6, %c0_7] : memref<8x32xf32, #tpu.memory_space<vmem>>, vector<8x32xf32>
    %15 = arith.truncf %8 : vector<8x16xf32> to vector<8x16xbf16>
    %c0_8 = arith.constant 0 : index
    %c0_9 = arith.constant 0 : index
    %16 = vector.load %arg2[%c0_8, %c0_9] : memref<16x32xbf16, #tpu.memory_space<vmem>>, vector<16x32xbf16>
    %cst_10 = arith.constant dense<0.000000e+00> : vector<8x32xf32>
    %17 = tpu.matmul %15, %16, %cst_10 {dimension_numbers = #tpu.dot_dimension_numbers<[1], [0], [0], [1], [0, 0, 1, 1], [], []>} : vector<8x16xbf16>, vector<16x32xbf16>, vector<8x32xf32> -> vector<8x32xf32>
    %18 = arith.addf %14, %17 : vector<8x32xf32>
    %c0_11 = arith.constant 0 : index
    %c0_12 = arith.constant 0 : index
    %19 = vector.load %arg8[%c0_11, %c0_12] : memref<8x32xf32, #tpu.memory_space<vmem>>, vector<8x32xf32>
    tpu.vector_store %arg8[%c0_11, %c0_12], %18 {strides = array<i32>} : memref<8x32xf32, #tpu.memory_space<vmem>>, vector<8x32xf32>,
    %c0_i32_13 = arith.constant 0 : i32
    %20 = arith.cmpi eq, %arg0, %c0_i32_13 : i32
    %21 = arith.extui %20 : i1 to i32
    %c0_i32_14 = arith.constant 0 : i32
    %22 = arith.cmpi ne, %21, %c0_i32_14 : i32
    scf.if %22 {
      %c0_15 = arith.constant 0 : index
      %c0_16 = arith.constant 0 : index
      %23 = vector.load %arg9[%c0_15, %c0_16] : memref<8x1xf32, #tpu.memory_space<vmem>>, vector<8x1xf32>
      %cst_17 = arith.constant 1.000000e+00 : f32
      %24 = vector.broadcast %cst_17 : f32 to vector<8x1xf32>
      %25 = arith.maximumf %23, %24 : vector<8x1xf32>
      %26 = tpu.reciprocal %25 {approx = true} : vector<8x1xf32> -> vector<8x1xf32>
      %c0_18 = arith.constant 0 : index
      %c0_19 = arith.constant 0 : index
      %27 = vector.load %arg8[%c0_18, %c0_19] : memref<8x32xf32, #tpu.memory_space<vmem>>, vector<8x32xf32>
      %28 = vector.broadcast %26 : vector<8x1xf32> to vector<8x32xf32>
      %29 = arith.mulf %27, %28 : vector<8x32xf32>
      %c0_20 = arith.constant 0 : index
      %c0_21 = arith.constant 0 : index
      %30 = vector.load %arg3[%c0_20, %c0_21] : memref<32x16xf32, #tpu.memory_space<vmem>>, vector<32x16xf32>
      %cst_22 = arith.constant dense<0.000000e+00> : vector<8x16xf32>
      %31 = tpu.matmul %29, %30, %cst_22 {dimension_numbers = #tpu.dot_dimension_numbers<[1], [0], [0], [1], [0, 0, 1, 1], [], []>} : vector<8x32xf32>, vector<32x16xf32>, vector<8x16xf32> -> vector<8x16xf32>
      %c0_23 = arith.constant 0 : index
      %c0_24 = arith.constant 0 : index
      %32 = vector.load %arg4[%c0_23, %c0_24] : memref<1x16xf32, #tpu.memory_space<vmem>>, vector<1x16xf32>
      %33 = vector.broadcast %32 : vector<1x16xf32> to vector<8x16xf32>
      %34 = arith.addf %31, %33 : vector<8x16xf32>
      %cst_25 = arith.constant 0.000000e+00 : f32
      %35 = vector.broadcast %cst_25 : f32 to vector<8x16xf32>
      %36 = arith.maximumf %34, %35 : vector<8x16xf32>
      %c0_26 = arith.constant 0 : index
      %c0_27 = arith.constant 0 : index
      %37 = vector.load %arg5[%c0_26, %c0_27] : memref<16x128xf32, #tpu.memory_space<vmem>>, vector<16x128xf32>
      %cst_28 = arith.constant dense<0.000000e+00> : vector<8x128xf32>
      %38 = tpu.matmul %36, %37, %cst_28 {dimension_numbers = #tpu.dot_dimension_numbers<[1], [0], [0], [1], [0, 0, 1, 1], [], []>} : vector<8x16xf32>, vector<16x128xf32>, vector<8x128xf32> -> vector<8x128xf32>
      %c0_29 = arith.constant 0 : index
      %c0_30 = arith.constant 0 : index
      %39 = vector.load %arg6[%c0_29, %c0_30] : memref<1x128xf32, #tpu.memory_space<vmem>>, vector<1x128xf32>
      %40 = vector.broadcast %39 : vector<1x128xf32> to vector<8x128xf32>
      %41 = arith.addf %38, %40 : vector<8x128xf32>
      %c0_31 = arith.constant 0 : index
      %c0_32 = arith.constant 0 : index
      %42 = vector.load %arg7[%c0_31, %c0_32] : memref<8x128xf32, #tpu.memory_space<vmem>>, vector<8x128xf32>
      tpu.vector_store %arg7[%c0_31, %c0_32], %41 {strides = array<i32>} : memref<8x128xf32, #tpu.memory_space<vmem>>, vector<8x128xf32>,
    } else {
    }
    return
  }
  func.func @transform_0(%arg0: i32) -> (i32, i32) {
    %c0_i32 = arith.constant 0 : i32
    %c0_i32_0 = arith.constant 0 : i32
    return %c0_i32, %arg0 : i32, i32
  }
  func.func @transform_1(%arg0: i32) -> (i32, i32) {
    %c0_i32 = arith.constant 0 : i32
    %c0_i32_0 = arith.constant 0 : i32
    return %arg0, %c0_i32 : i32, i32
  }
  func.func @transform_2(%arg0: i32) -> (i32, i32) {
    %c0_i32 = arith.constant 0 : i32
    %c0_i32_0 = arith.constant 0 : i32
    %c0_i32_1 = arith.constant 0 : i32
    return %c0_i32, %c0_i32_0 : i32, i32
  }
  func.func @transform_3(%arg0: i32) -> (i32, i32) {
    %c0_i32 = arith.constant 0 : i32
    %c0_i32_0 = arith.constant 0 : i32
    %c0_i32_1 = arith.constant 0 : i32
    return %c0_i32, %c0_i32_0 : i32, i32
  }
  func.func @transform_4(%arg0: i32) -> (i32, i32) {
    %c0_i32 = arith.constant 0 : i32
    %c0_i32_0 = arith.constant 0 : i32
    %c0_i32_1 = arith.constant 0 : i32
    return %c0_i32, %c0_i32_0 : i32, i32
  }
  func.func @transform_5(%arg0: i32) -> (i32, i32) {
    %c0_i32 = arith.constant 0 : i32
    %c0_i32_0 = arith.constant 0 : i32
    %c0_i32_1 = arith.constant 0 : i32
    return %c0_i32, %c0_i32_0 : i32, i32
  }
  func.func @transform_6(%arg0: i32) -> (i32, i32) {
    %c0_i32 = arith.constant 0 : i32
    %c0_i32_0 = arith.constant 0 : i32
    %c0_i32_1 = arith.constant 0 : i32
    return %c0_i32, %c0_i32_0 : i32, i32
  }
}

</mosaic_0001>

<bundles_post_ra>
// kernel: classifier_forward.1
= control target key start
LH: loop header
LB: loop body
LE: loop exit
PB: predicated region body
PF: predicated region fallthrough
CT: control target
= control target key end

     0   :  { %vm30_vm0 = vcmask 7168   ;;  %v33_v0 = vlaneseq  ;;  %v172_v1 = vmov 0.0   ;;  %vm40_vm1 = vcmask 130048   ;;  %s250_s0 = inlined_call_operand.vmem [shape: s32[1,16], index: 0, kind: input, shape index: {}]   ;;  %s251_s1 = inlined_call_operand.vmem [shape: bf16[16,32], index: 1, kind: input, shape index: {}]   ;;  %s252_s2 = inlined_call_operand.vmem [shape: f32[32,16], index: 2, kind: input, shape index: {}]   ;;  %s253_s3 = inlined_call_operand.vmem [shape: f32[1,16], index: 3, kind: input, shape index: {}]   ;;  %s254_s5 = inlined_call_operand.vmem [shape: f32[1,128], index: 5, kind: input, shape index: {}]   ;;  %s255_s4 = inlined_call_operand.vmem [shape: f32[16,128], index: 4, kind: input, shape index: {}]   ;;  %s256_s6 = inlined_call_operand.vmem [shape: f32[8,128], index: 6, kind: output, shape index: {}]  }
   0x1   :  { %31 = vst.msk [vmem:[#allocation3] sm:$0xff] %vm30_vm0, %v172_v1  ;;  %v167_v2 = vld [vmem:[%s250_s0] ss:$0 sm:$0xff]  ;;  %v173_v8 = vmov 0   ;;  %vm28_vm3 = vcmask 261120   ;;  %v92_v9 = vld [vmem:[%s252_s2 + $0x18] sm:$0xff] }
   0x2   :  { %v163_v3 = vld [vmem:[%s251_s1] sm:$0xff]  ;;  %v34_v4 = vshrl.u32 %v33_v0, 7  ;;  %166 = vset.pattern.permute.xlu0 %v173_v8  ;;  %v91_v10 = vld [vmem:[%s252_s2 + $0x10] sm:$0xff]  ;;  %29 = vst.msk [vmem:[#allocation2] sm:$0xff] %vm28_vm3, %v172_v1  ;;  %112 = vmatpush.msra.mxu1 %v92_v9  ;;  %v90_v11 = vld [vmem:[%s252_s2 + $0x8] sm:$0xff] }
   0x3   :  { %67 = vmatpush.bf16.msra.mxu0 %v163_v3  ;;  %v89_v22 = vld [vmem:[%s252_s2] sm:$0xff]  ;;  %v122_v26 = vld [vmem:[%s255_s4 + $0x8] sm:$0xff] }
   0x4   :  { %vm36_vm2 = vcmp.eq.s32.totalorder %v34_v4, %v167_v2  ;;  %113 = vmatpush.msra.mxu1 %v91_v10  ;;  %144 = vmatpush.msra.mxu2 %v122_v26  ;;  %v121_v27 = vld [vmem:[%s255_s4] sm:$0xff] }
   0x5   :  { %v155_v5 = vsel %vm36_vm2, 1.0, %v172_v1  ;;  %v168_v28 = vld [vmem:[%s253_s3] ss:$0 sm:$0xff] }
   0x6   :  { %v41_v6 = vsel %vm40_vm1, %v155_v5, 0.0  ;;  %v48_v7 = vpack.c.bf16 %v155_v5, %v155_v5  ;;  %114 = vmatpush.msra.mxu1 %v90_v11  ;;  %145 = vmatpush.msra.mxu2 %v121_v27  ;;  %v169_v32 = vld [vmem:[%s254_s5] ss:$0 sm:$0xff] }
   0x7   :  { %42 = vadd.xlane.f32.xlu0 %v41_v6 }
   0x8   :  { %160 = vmatmul.msk.bf16.vlgmr.msra.gmra.mxu0 %vm40_vm1, %v48_v7  ;;  %v39_v12 = vld [vmem:[#allocation3] sm:$0xff]  ;;  %115 = vmatpush.msra.mxu1 %v89_v22 }
   0x9   :  { %v47_v15 = vld [vmem:[#allocation2] sm:$0xff] }
  0x7a   :  { %v43_v13 = vpop.xlane.xlu0 %42 }
  0x7b   :  { %v44_v14 = vadd.f32 %v43_v13, %v39_v12 }
  0x7d   :  { %46 = vst.msk [vmem:[#allocation3] sm:$0xff] %vm30_vm0, %v44_v14 }
  0x84   :  { %v79_v16 = vld [vmem:[#allocation3] sm:$0xff] }
  0x85   :  { %v80_v17 = vmax.f32 %v79_v16, 1.0  ;;  %v69_v18 = vpop.f32.mrf.mxu0 }
  0x86   :  { %v73_v19 = vadd.f32 %v69_v18, %v47_v15 }
  0x87   :  { %170 = vrcp.f32 %v80_v17 }
  0x88   :  { %75 = vst.msk [vmem:[#allocation2] sm:$0xff] %vm28_vm3, %v73_v19 }
  0x8d   :  { %v171_v20 = vpop.eup %170  ;;  %v71_v21 = vpop.f32.mrf.mxu0 }
  0x8e   :  { %85 = vperm.xlu0 %166, %v171_v20  }
  0x8f   :  { %v82_v23 = vld [vmem:[#allocation2] sm:$0xff] }
 0x100   :  { %v86_v24 = vpop.permute.xlu0 %85 }
 0x101   :  { %v88_v25 = vmul.f32 %v86_v24, %v82_v23 }
 0x103   :  { %161 = vmatmul.msk.f32.vlgmr.msra.gmra.mxu1 %vm28_vm3, %v88_v25 }
 0x180   :  { %v117_v29 = vpop.f32.mrf.mxu1 }
 0x181   :  { %v118_v30 = vadd.f32 %v168_v28, %v117_v29 }
 0x183   :  { %v120_v31 = vmax.f32 %v118_v30, 0.0 }
 0x185   :  { %162 = vmatmul.msk.f32.vlgmr.msra.gmra.mxu2 %vm40_vm1, %v120_v31 }
 0x208   :  { %v147_v33 = vpop.f32.mrf.mxu2 }
 0x209   :  { %v148_v34 = vadd.f32 %v169_v32, %v147_v33 }
 0x20b   :  { %150 = vst [vmem:[%s256_s6] sm:$0xff] %v148_v34 }

</bundles_post_ra>
